<compile_context>
chip_gen: v6e
topology: v6e:2x2x1
jax: 0.10.0
libtpu: 0.0.40
codegen_flags: <defaults>
</compile_context>

<pallas_src>
import functools

import jax
import jax.numpy as jnp
from jax.experimental import pallas as pl
from jax.experimental.pallas import tpu as pltpu


# ----------------------------- quant_util equivalents -----------------------------

def get_quantized_range(num_bits, signed=True):
    if signed:
        n = 2 ** (num_bits - 1)
        return -n, n - 1
    return 0, 2 ** num_bits - 1


def symmetric_linear_quantization_scale_factor(num_bits, saturation_val):
    return (2.0 ** (num_bits - 1) - 1.0) / saturation_val


def linear_quantize_clamp(x, scale, clamp_min, clamp_max):
    return jnp.clip(jnp.round(x * scale), clamp_min, clamp_max)


def _round_up(x, m):
    return ((x + m - 1) // m) * m


# ----------------------------- Pallas kernel -----------------------------

def _qmatmul_kernel(x_ref, w_ref, b_ref, o_ref, *, inv_scale):
    """out = (x @ W_q + B_q) * (1/w_scale) for one (tm, tn) output tile.

    x_ref: (tm, Kp)  bf16   im2col / activation rows (K zero-padded, lane dense)
    w_ref: (Kp, tn)  bf16   integer-valued quantized weights (exact in bf16), grid-resident
    b_ref: (1,  tn)  f32    quantized bias, grid-resident
    o_ref: (tm, tn)  f32    lane-dense output tile (tn % 128 == 0)
    """
    acc = jnp.dot(x_ref[...], w_ref[...], preferred_element_type=jnp.float32)
    o_ref[...] = (acc + b_ref[...]) * inv_scale   # f32 VPU epilogue; single store


def quantized_matmul(x2d, w_pad, b_pad, inv_scale):
    """(x2d @ w_pad[:K] + b_pad) * inv_scale via a tiled Pallas matmul.

    x2d  : (M, K)     f32 activations / im2col rows (K <= Kp)
    w_pad: (Kp, OCp)  bf16, K padded to Kp (multiple of 128), OC padded to OCp (mult of 128)
    b_pad: (1, OCp)   f32
    Returns (M, OCp) f32 (caller slices off the OC padding).
    """
    M, K = x2d.shape
    Kp, OCp = w_pad.shape
    assert K <= Kp and Kp % 128 == 0 and OCp % 128 == 0

    tm = min(256, _round_up(M, 16))          # 16-row aligned (bf16 sublane packing)
    Mp = _round_up(M, tm)
    tn = OCp if OCp <= 512 else (256 if OCp % 256 == 0 else 128)
    grid = (Mp // tm, OCp // tn)

    x_pad = jnp.pad(x2d, ((0, Mp - M), (0, Kp - K))).astype(jnp.bfloat16)

    # Per-generation VMEM budget: double-buffered blocks + headroom, capped at ~3/4 of
    # physical VMEM (=> ~96 MiB on v5e/v6e with 128 MiB, ~48 MiB on v7x with 64 MiB).
    x_blk = tm * Kp * 2
    w_blk = Kp * tn * 2
    b_blk = tn * 4
    o_blk = tm * tn * 4
    need = 2 * (x_blk + w_blk + b_blk + o_blk) + (4 << 20)
    try:
        vmem_cap = pltpu.get_tpu_info().vmem_capacity_bytes
    except Exception:  # conservative fallback if the query is unavailable
        vmem_cap = 64 << 20
    vmem_limit = int(max(8 << 20, min(need, (vmem_cap * 3) // 4, 112 << 20)))

    # NOTE: w_pad / b_pad blocks are grid-resident (same block index every step).
    # TODO(synk): single-buffer them (pipeline_mode=pl.Buffered(1)) when Kp*OCp grows large
    #             enough for the second buffer to matter on v7x; negligible at these sizes.
    # TODO(synk): for very large K (>~16k) add a third "arbitrary" grid axis over K with a
    #             VMEM f32 accumulator instead of a single full-K contraction.
    return pl.pallas_call(
        functools.partial(_qmatmul_kernel, inv_scale=inv_scale),
        out_shape=jax.ShapeDtypeStruct((Mp, OCp), jnp.float32),
        grid=grid,
        in_specs=[
            pl.BlockSpec((tm, Kp), lambda mi, ni: (mi, 0)),   # activation rows
            pl.BlockSpec((Kp, tn), lambda mi, ni: (0, ni)),   # weights (grid-resident per ni)
            pl.BlockSpec((1, tn), lambda mi, ni: (0, ni)),    # bias    (grid-resident per ni)
        ],
        out_specs=pl.BlockSpec((tm, tn), lambda mi, ni: (mi, ni)),
        compiler_params=pltpu.CompilerParams(
            dimension_semantics=("parallel", "parallel"),     # both axes shard across TCs
            vmem_limit_bytes=vmem_limit),
    )(x_pad, w_pad, b_pad)[:M]


# ----------------------------- im2col (wrapper side) -----------------------------

def _im2col(x_nchw, KH, KW):
    """NCHW -> (N*H*W, KH*KW*Cin) im2col rows for stride-1 'same' conv (odd KH/KW)."""
    N, Cin, H, W = x_nchw.shape
    ph, pw = KH // 2, KW // 2
    x = jnp.transpose(x_nchw, (0, 2, 3, 1)).astype(jnp.float32)          # NHWC
    xp = jnp.pad(x, ((0, 0), (ph, ph), (pw, pw), (0, 0)))
    taps = [xp[:, ky:ky + H, kx:kx + W, :] for ky in range(KH) for kx in range(KW)]
    patches = jnp.concatenate(taps, axis=-1)                             # (N, H, W, KH*KW*Cin)
    return patches.reshape(N * H * W, KH * KW * Cin)


# ----------------------------- WrapperLayer (Conv2d) -----------------------------

class WrapperLayerConv2d:
    """JAX/Pallas port of WrapperLayer around nn.Conv2d(Cin, OC, k, stride=1, 'same' pad)."""

    # TODO(synk): training-mode _prepare() (per-step re-quantization) is not implemented;
    #             only the eval forward path is reproduced.

    def __init__(self, weight, bias, bits_params):
        # weight: [OC, Cin, KH, KW] (PyTorch conv layout), bias: [OC]
        OC, Cin, KH, KW = weight.shape
        # TODO(synk): even kernel sizes would need PyTorch's asymmetric 'same' padding.
        assert KH % 2 == 1 and KW % 2 == 1, "only odd kernel sizes supported"

        self.bits_params = bits_params
        qmin, qmax = get_quantized_range(bits_params, signed=True)
        weights_max = jnp.max(jnp.abs(weight))
        w_scale = symmetric_linear_quantization_scale_factor(bits_params, weights_max)
        self.weight_q = linear_quantize_clamp(weight, w_scale, qmin, qmax)
        self.bias_q = linear_quantize_clamp(bias, w_scale, qmin, qmax)
        self.w_scale = jnp.asarray(w_scale, jnp.float32)
        self.inv_scale = 1.0 / float(w_scale)       # baked into the kernel's f32 epilogue

        self.OC, self.Cin, self.KH, self.KW = OC, Cin, KH, KW
        K = KH * KW * Cin
        self.Kp = _round_up(max(K, 128), 128)       # lane-dense contraction dim
        self.OCp = _round_up(max(OC, 128), 128)     # lane-dense output dim

        # [OC,Cin,KH,KW] -> [KH,KW,Cin,OC] -> [K, OC] (matches im2col tap order), zero-padded
        # to (Kp, OCp).  W_q is integer-valued in [-128,127] => exact in bf16; 1/w_scale is
        # NOT folded into the bf16 weights (applied in the f32 epilogue instead).
        w_mat = jnp.transpose(self.weight_q, (2, 3, 1, 0)).reshape(K, OC)
        self.w_pad = jnp.pad(w_mat, ((0, self.Kp - K),
                                     (0, self.OCp - OC))).astype(jnp.bfloat16)
        self.b_pad = jnp.pad(self.bias_q.reshape(1, OC),
                             ((0, 0), (0, self.OCp - OC))).astype(jnp.float32)

    def __call__(self, x_nchw):
        N, Cin, H, W = x_nchw.shape
        assert Cin == self.Cin
        # Small-Cin path: wrapper-side im2col yields a lane-dense K = KH*KW*Cin contraction.
        # TODO(synk): for large Cin (KH*KW*Cin >> 128) switch to a halo'd NHWC block per grid
        #             step with in-kernel tap assembly to avoid the KH*KW HBM duplication.
        patches = _im2col(x_nchw, self.KH, self.KW)                       # (N*H*W, K)
        out = quantized_matmul(patches, self.w_pad, self.b_pad, self.inv_scale)
        out = out[:, :self.OC].reshape(N, H, W, self.OC)
        return jnp.transpose(out, (0, 3, 1, 2))                           # NCHW


# ----------------------------- WrapperLayer (Linear) -----------------------------

class WrapperLayerLinear:
    """JAX/Pallas port of WrapperLayer around nn.Linear(IN, OUT) (same matmul kernel)."""

    def __init__(self, weight, bias, bits_params):
        # weight: [OUT, IN] (PyTorch layout), bias: [OUT]
        OUT, IN = weight.shape
        self.bits_params = bits_params
        qmin, qmax = get_quantized_range(bits_params, signed=True)
        w_scale = symmetric_linear_quantization_scale_factor(bits_params,
                                                             jnp.max(jnp.abs(weight)))
        self.weight_q = linear_quantize_clamp(weight, w_scale, qmin, qmax)
        self.bias_q = linear_quantize_clamp(bias, w_scale, qmin, qmax)
        self.w_scale = jnp.asarray(w_scale, jnp.float32)
        self.inv_scale = 1.0 / float(w_scale)

        self.OUT, self.IN = OUT, IN
        Kp = _round_up(max(IN, 128), 128)
        OCp = _round_up(max(OUT, 128), 128)
        self.w_pad = jnp.pad(jnp.transpose(self.weight_q),                # (IN, OUT)
                             ((0, Kp - IN), (0, OCp - OUT))).astype(jnp.bfloat16)
        self.b_pad = jnp.pad(self.bias_q.reshape(1, OUT),
                             ((0, 0), (0, OCp - OUT))).astype(jnp.float32)

    def __call__(self, x):
        B, IN = x.shape
        assert IN == self.IN
        out = quantized_matmul(x.astype(jnp.float32), self.w_pad, self.b_pad, self.inv_scale)
        return out[:, :self.OUT]


# ----------------------------- references & main -----------------------------

def reference_conv_forward(x_nchw, weight_q, bias_q, w_scale):
    _, _, KH, KW = weight_q.shape
    out = jax.lax.conv_general_dilated(
        x_nchw.astype(jnp.float32), weight_q.astype(jnp.float32),
        window_strides=(1, 1),
        padding=((KH // 2, KH // 2), (KW // 2, KW // 2)),
        dimension_numbers=("NCHW", "OIHW", "NCHW"))
    out = out + bias_q.reshape(1, -1, 1, 1)
    return out / w_scale


def reference_linear_forward(x, weight_q, bias_q, w_scale):
    return (x @ weight_q.T + bias_q) / w_scale


if __name__ == "__main__":
    key = jax.random.PRNGKey(0)
    k_x, k_w, k_b, k_lx, k_lw, k_lb = jax.random.split(key, 6)

    # --- Conv2d branch ---
    N, Cin, H, W = 2, 4, 16, 16
    OC, KH, KW = 8, 3, 3
    bits = 8

    x = jax.random.normal(k_x, (N, Cin, H, W), jnp.float32)
    weight = jax.random.normal(k_w, (OC, Cin, KH, KW), jnp.float32) * 0.1
    bias = jax.random.normal(k_b, (OC,), jnp.float32) * 0.1

    conv_layer = WrapperLayerConv2d(weight, bias, bits)
    out = jax.block_until_ready(conv_layer(x))
    ref = reference_conv_forward(x, conv_layer.weight_q, conv_layer.bias_q, conv_layer.w_scale)
    assert out.shape == (N, OC, H, W)
    # bf16 activations on the MXU (f32 accumulate / f32 epilogue) => slightly loosened tol.
    assert jnp.allclose(out, ref, atol=2e-2, rtol=2e-2), "conv mismatch vs reference"

    # --- Linear branch ---
    B, IN, OUT = 8, 32, 16
    xl = jax.random.normal(k_lx, (B, IN), jnp.float32)
    lw = jax.random.normal(k_lw, (OUT, IN), jnp.float32) * 0.1
    lb = jax.random.normal(k_lb, (OUT,), jnp.float32) * 0.1

    lin_layer = WrapperLayerLinear(lw, lb, bits)
    outl = jax.block_until_ready(lin_layer(xl))
    refl = reference_linear_forward(xl, lin_layer.weight_q, lin_layer.bias_q, lin_layer.w_scale)
    assert outl.shape == (B, OUT)
    assert jnp.allclose(outl, refl, atol=2e-2, rtol=2e-2), "linear mismatch vs reference"

    print("KERNEL_OK")
</pallas_src>

<mosaic_0001>
module attributes {stable_mosaic.version = 11 : i64} {
  func.func @_qmatmul_kernel(%arg0: i32, %arg1: i32, %arg2: memref<256x128xbf16, #tpu.memory_space<vmem>>, %arg3: memref<128x128xbf16, #tpu.memory_space<vmem>>, %arg4: memref<1x128xf32, #tpu.memory_space<vmem>>, %arg5: memref<256x128xf32, #tpu.memory_space<vmem>>) attributes {dimension_semantics = [#tpu.dimension_semantics<parallel>, #tpu.dimension_semantics<parallel>], iteration_bounds = array<i64: 2, 1>, scalar_prefetch = 0 : i64, scratch_operands = 0 : i64, tpu.core_type = #tpu.core_type<tc>, window_params = [{transform_indices = @transform_0, window_bounds = array<i64: 256, 128>}, {transform_indices = @transform_1, window_bounds = array<i64: 128, 128>}, {transform_indices = @transform_2, window_bounds = array<i64: 1, 128>}, {transform_indices = @transform_3, window_bounds = array<i64: 256, 128>}]} {
    %c0 = arith.constant 0 : index
    %c0_0 = arith.constant 0 : index
    %0 = vector.load %arg2[%c0, %c0_0] : memref<256x128xbf16, #tpu.memory_space<vmem>>, vector<256x128xbf16>
    %c0_1 = arith.constant 0 : index
    %c0_2 = arith.constant 0 : index
    %1 = vector.load %arg3[%c0_1, %c0_2] : memref<128x128xbf16, #tpu.memory_space<vmem>>, vector<128x128xbf16>
    %cst = arith.constant dense<0.000000e+00> : vector<256x128xf32>
    %2 = tpu.matmul %0, %1, %cst {dimension_numbers = #tpu.dot_dimension_numbers<[1], [0], [0], [1], [0, 0, 1, 1], [], []>} : vector<256x128xbf16>, vector<128x128xbf16>, vector<256x128xf32> -> vector<256x128xf32>
    %c0_3 = arith.constant 0 : index
    %c0_4 = arith.constant 0 : index
    %3 = vector.load %arg4[%c0_3, %c0_4] : memref<1x128xf32, #tpu.memory_space<vmem>>, vector<1x128xf32>
    %4 = vector.broadcast %3 : vector<1x128xf32> to vector<256x128xf32>
    %5 = arith.addf %2, %4 : vector<256x128xf32>
    %cst_5 = arith.constant 0.00283008767 : f32
    %6 = vector.broadcast %cst_5 : f32 to vector<256x128xf32>
    %7 = arith.mulf %5, %6 : vector<256x128xf32>
    %c0_6 = arith.constant 0 : index
    %c0_7 = arith.constant 0 : index
    %8 = vector.load %arg5[%c0_6, %c0_7] : memref<256x128xf32, #tpu.memory_space<vmem>>, vector<256x128xf32>
    tpu.vector_store %arg5[%c0_6, %c0_7], %7 {strides = array<i32>} : memref<256x128xf32, #tpu.memory_space<vmem>>, vector<256x128xf32>,
    return
  }
  func.func @transform_0(%arg0: i32, %arg1: i32) -> (i32, i32) {
    %c0_i32 = arith.constant 0 : i32
    %c0_i32_0 = arith.constant 0 : i32
    return %arg0, %c0_i32 : i32, i32
  }
  func.func @transform_1(%arg0: i32, %arg1: i32) -> (i32, i32) {
    %c0_i32 = arith.constant 0 : i32
    %c0_i32_0 = arith.constant 0 : i32
    return %c0_i32, %arg1 : i32, i32
  }
  func.func @transform_2(%arg0: i32, %arg1: i32) -> (i32, i32) {
    %c0_i32 = arith.constant 0 : i32
    %c0_i32_0 = arith.constant 0 : i32
    return %c0_i32, %arg1 : i32, i32
  }
  func.func @transform_3(%arg0: i32, %arg1: i32) -> (i32, i32) {
    %c0_i32 = arith.constant 0 : i32
    return %arg0, %arg1 : i32, i32
  }
}

</mosaic_0001>

<bundles_post_ra>
// kernel: tpu_custom_call.1
= control target key start
LH: loop header
LB: loop body
LE: loop exit
PB: predicated region body
PF: predicated region fallthrough
CT: control target
= control target key end

     0   :  { %8 = vsyncpa [#allocation3], 0  ;;  %s1467_s0 = inlined_call_operand.hbm [shape: bf16[512,128], index: 0, kind: input, shape index: {}]   ;;  %s1468_s1 = inlined_call_operand.hbm [shape: bf16[128,128], index: 1, kind: input, shape index: {}]   ;;  %s1469_s2 = inlined_call_operand.vmem [shape: f32[1,128], index: 2, kind: input, shape index: {}]   ;;  %s1470_s3 = inlined_call_operand.hbm [shape: f32[512,128], index: 3, kind: output, shape index: {}]  }
   0x1   :  { %10 = vsyncpa [#allocation3 + $0x1], 0 }
   0x2   :  { %11 = vsyncpa [#allocation6], 0 }
   0x3   :  { %12 = vsyncpa [#allocation4], 0 }
   0x4   :  { %14 = vsyncpa [#allocation4 + $0x1], 0  ;;  %s1189_s12 = smov 0   ;;  %s1191_s13 = smov 0  }
   0x5   :  { %s1193_s14 = smov 0   ;;  %s1195_s15 = smov 0  }
   0x6   :  { %s1197_s16 = smov 0   ;;  %s1199_s17 = smov 0  }
   0x7 LB: > { %s788_s18 = sadd.s32 4294967295, %s1160_s17   ;;  %s789_s19 = sadd.s32 4294967294, %s1160_s17   ;;  %s1160_s17 = sphi %s1199_s17, %s20_s17   ;;  %s1156_s16 = sphi %s1197_s16, %s1492_s16   ;;  %s1152_s15 = sphi %s1195_s15, %s1491_s15   ;;  %s1148_s14 = sphi %s1193_s14, %s1490_s14   ;;  %s1144_s13 = sphi %s1191_s13, %s1489_s13   ;;  %s1140_s12 = sphi %s1189_s12, %s1488_s12  }
   0x8   : > { %p52_p0 = scmp.ne.s32.totalorder %s1144_s13, %s1140_s12  ;;  %p1223_p1 = scmp.eq.s32.totalorder %s788_s18, 0 }
   0x9   : > { %p1227_p2 = scmp.eq.s32.totalorder %s788_s18, 1  ;;  %p136_p3 = scmp.eq.s32.totalorder %s789_s19, 1 }
   0xa   : > { %p1233_p4 = por %p1223_p1, %p52_p0  ;;  %p790_p5 = scmp.ge.s32.totalorder %s1160_s17, 1 }
   0xb   : > { %p1238_p6 = por %p136_p3, %p52_p0  ;;  %p143_p7 = scmp.lt.s32.totalorder %s1160_s17, 3 }
   0xc   : > { %s1476_s22 = scalar_select %p1233_p4, 1, 0 }
   0xd   : > { %s1477_s23 = scalar_select %p1238_p6, 1, 0 }
   0xe   : > { %p1243_p8 = pnand %p790_p5, %p143_p7  ;;  %s1162_s25 = smov [#allocation5]  }
   0xf   : > { %s157_s26 = sshll.u32 %s1162_s25, 4  ;;  %s32_s28 = sadd.s32 1, %s1156_s16  ;;  %s158_s26 = int_to_ptr.vmem [resolvable:$true] %s157_s26 }
  0x10   : > { %p929_p9 = pneg %p1243_p8  ;;  %s1033_s29 = scalar_lea.vmem %s158_s26, 1024 }
  0x11   : > { %p1034_p13 = scmp.ne.s32.totalorder %s158_s26, %s1033_s29  ;;  %p1041_p5 = scmp.lt.s32.totalorder %s158_s26, %s158_s26 }
  0x12   : > { %p1252_p11 = pnand %p929_p9, %p1223_p1  ;;  %p1042_p7 = scmp.lt.s32.totalorder %s1033_s29, %s1033_s29 }
  0x14   : > { %p1024_p12 = pneg %p1252_p11  ;;  %p1043_p6 = por %p1042_p7, %p1041_p5 }
  0x16   : > { %p1036_p0 = pnand %p1034_p13, %p1024_p12 }
  0x18   : > { %p1037_p3 = pneg %p1036_p0 }
  0x1a   : > { %p1044_p4 = pnand %p1043_p6, %p1037_p3 }
  0x1c   : > { %1047 = shalt.err (!%p1044_p4)
}
  0x1d   : > { %s1472_s30 = smov 64   ;;  %s1473_s4 = smov 4  }
  0x1e   : > { %932 = dma.hbm_to_vmem [thread:$0]  (!%p1252_p11), %s1468_s1, 1024, %s158_s26, [#allocation6], %s1472_s30, %s1472_s30, %s1473_s4  }
  0x1f   : > { %p34_p4 = scmp.ge.s32.totalorder %s32_s28, 2  ;;  %s39_s7 = sadd.s32 1, %s1148_s14 }
  0x20   : > { %p46_p6 = scmp.ne.s32.totalorder %s1148_s14, %s1144_s13  ;;  %p47_p9 = scmp.eq.s32.totalorder %s1160_s17, 0 }
  0x21   : > { %s1494_s28 = smov (%p34_p4, %s32_s28), 0  ;;  %p942_p0 = scmp.lt.s32.totalorder %s1160_s17, 2 }
  0x22   : > { %p1273_p12 = por %p47_p9, %p46_p6  ;;  %p1279_p13 = por %p1227_p2, %p46_p6 }
  0x23   : > { %s36_s10 = ssub.s32 %s1156_s16, %s1494_s28  ;;  %s177_s11 = sand.u32 1, %s1148_s14  }
  0x24   : > { %p37_p11 = scmp.eq.s32.totalorder %s36_s10, 0  ;;  %s794_s18 = sshll.u32 %s177_s11, 7 }
  0x25   : > { %s831_s25 = sshll.u32 %s1156_s16, 11  ;;  %s181_s5 = scalar_lea.vmem [#allocation2], %s794_s18 }
  0x26   : > { %s1288_s19 = scalar_select %p37_p11, %s1148_s14, %s39_s7  }
  0x27   : > { %s187_s29 = scalar_lea.hbm %s1467_s0, %s831_s25  ;;  %s188_s6 = sshll.u32 %s181_s5, 4  ;;  %s189_s6 = int_to_ptr.vmem [resolvable:$true] %s188_s6 }
  0x28   : > { %p1296_p2 = pnand %p942_p0, %p1273_p12  ;;  %s178_s30 = scalar_lea.sflag [#allocation3], %s177_s11 }
  0x29   : > { %s1061_s10 = scalar_lea.vmem %s189_s6, 2048  ;;  %s1165_s7 = smov [#allocation2]  }
  0x2a   : > { %p1050_p3 = pneg %p1296_p2  ;;  %p1062_p5 = scmp.ne.s32.totalorder %s189_s6, %s1061_s10 }
  0x2b   : > { %s1066_s4 = sshll.u32 %s1165_s7, 4  ;;  %s1067_s4 = int_to_ptr.vmem [resolvable:$false] %s1066_s4 }
  0x2c   : > { %p1064_p7 = pnand %p1062_p5, %p1050_p3  ;;  %s1068_s25 = scalar_lea.vmem %s1067_s4, 4096 }
  0x2d   : > { %p1069_p6 = scmp.lt.s32.totalorder %s189_s6, %s1067_s4  ;;  %p1070_p9 = scmp.lt.s32.totalorder %s1068_s25, %s1061_s10 }
  0x2e   : > { %p1065_p4 = pneg %p1064_p7 }
  0x2f   : > { %p1071_p11 = por %p1070_p9, %p1069_p6 }
  0x31   : > { %p1072_p10 = pnand %p1071_p11, %p1065_p4 }
  0x33   : > { %1075 = shalt.err (!%p1072_p10)
}
  0x34   : > { %s1483_s8 = smov 4   ;;  %s1484_s18 = smov 64  }
  0x35   : > { %936 = dma.hbm_to_vmem [thread:$0]  (!%p1296_p2), %s187_s29, 2048, %s189_s6, %s178_s30, %s1484_s18, %s1484_s18, %s1483_s8  }
  0x36   : > { %200 = sbr.rel (%p1243_p8) target bundleno = 336 (0x150), region = 32  ;;  %s1310_s11 = sand.u32 (!%p1243_p8), 1, %s1144_s13  }
  0x37   : > { %s798_s4 = sshll.u32 (!%p1243_p8), %s1310_s11, 7  ;;  %s203_s26 = scalar_lea.sflag (!%p1243_p8), [#allocation3], %s1310_s11 }
  0x38   : > { %s1314_s27 = scalar_lea.vmem (!%p1243_p8), [#allocation2], %s798_s4  ;;  %p1485_p10 = scmp.ne.s32.totalorder (!%p1243_p8), %s1476_s22, 0 }
  0x3b   : > { %1127 = dma.done.wait (%p1485_p10), %s203_s26, 2048  }
  0x3c   : > { %1129 = vsyncadd (%p1485_p10), %s203_s26, 4294965248 }
  0x3d   : > { %1131 = dma.done.wait (%p1223_p1), [#allocation6], 1024  }
  0x3e   : > { %1133 = vsyncadd (%p1223_p1), [#allocation6], 4294966272  ;;  %v998_v0 = vld [vmem:[#allocation5 + $0x38] sm:$0xff]   ;;  %v999_v1 = vld [vmem:[#allocation5 + $0x30] sm:$0xff]   ;;  %s800_s24 = sshll.u32 %s1310_s11, 8  ;;  %s832_s29 = sshll.u32 %s1152_s15, 12 }
  0x3f   : > { %857 = vmatprep.subr.bf16.mxu0 %v998_v0  ;;  %905 = vmatprep.subr.bf16.mxu1 %v998_v0  ;;  %v1000_v2 = vld [vmem:[#allocation5 + $0x28] sm:$0xff]   ;;  %v1001_v3 = vld [vmem:[#allocation5 + $0x20] sm:$0xff]   ;;  %v1002_v6 = vld [vmem:[#allocation5 + $0x18] sm:$0xff]   ;;  %s1350_s30 = scalar_lea.vmem [#allocation7], %s800_s24  ;;  %s1413_s10 = scalar_lea.hbm %s1470_s3, %s832_s29 }
  0x40   : > { %858 = vmatpush3.bf16.msra.mxu0 %v998_v0  ;;  %913 = vmatpush3.bf16.msra.mxu1 %v998_v0  ;;  %v1006_v4 = vld [vmem:[%s1314_s27] sm:$0xff]   ;;  %v1003_v7 = vld [vmem:[#allocation5 + $0x10] sm:$0xff]   ;;  %v1004_v8 = vld [vmem:[#allocation5 + $0x8] sm:$0xff]   ;;  %s681_s5 = sshll.u32 %s1350_s30, 4  ;;  %s667_s15 = scalar_lea.sflag [#allocation4], %s1310_s11  ;;  %s1415_s5 = int_to_ptr.vmem [resolvable:$true] %s681_s5 }
  0x41   : > { %859 = vmatprep.subr.bf16.mxu0 %v999_v1  ;;  %906 = vmatprep.subr.bf16.mxu1 %v999_v1  ;;  %v1007_v5 = vld [vmem:[%s1314_s27 + $0x40] sm:$0xff]   ;;  %v1008_v10 = vld [vmem:[%s1314_s27 + $0x8] sm:$0xff]   ;;  %v1010_v12 = vld [vmem:[%s1314_s27 + $0x10] sm:$0xff]   ;;  %s1076_s7 = scalar_lea.vmem %s1415_s5, 4096  ;;  %s1166_s25 = smov [#allocation7]  }
  0x42   : > { %873 = vmatprep.mubr.bf16.mxu0 %v1006_v4  ;;  %889 = vmatprep.mubr.bf16.mxu1 %v1007_v5  ;;  %v1005_v9 = vld [vmem:[#allocation5] sm:$0xff]   ;;  %v1009_v11 = vld [vmem:[%s1314_s27 + $0x48] sm:$0xff]   ;;  %v1011_v13 = vld [vmem:[%s1314_s27 + $0x50] sm:$0xff]   ;;  %p1077_p1 = scmp.ne.s32.totalorder %s1415_s5, %s1076_s7  ;;  %s1080_s8 = sshll.u32 %s1166_s25, 4  ;;  %s1081_s8 = int_to_ptr.vmem [resolvable:$false] %s1080_s8 }
  0x43   : > { %v1012_v14 = vld [vmem:[%s1314_s27 + $0x18] sm:$0xff]   ;;  %v1014_v16 = vld [vmem:[%s1314_s27 + $0x20] sm:$0xff]   ;;  %v1016_v18 = vld [vmem:[%s1314_s27 + $0x28] sm:$0xff]   ;;  %s1082_s18 = scalar_lea.vmem %s1081_s8, 8192  ;;  %p1083_p0 = scmp.lt.s32.totalorder %s1415_s5, %s1081_s8 }
  0x44   : > { %860 = vmatpush3.bf16.msra.mxu0 %v999_v1  ;;  %914 = vmatpush3.bf16.msra.mxu1 %v999_v1  ;;  %v1013_v15 = vld [vmem:[%s1314_s27 + $0x58] sm:$0xff]   ;;  %v1015_v17 = vld [vmem:[%s1314_s27 + $0x60] sm:$0xff]   ;;  %v1017_v19 = vld [vmem:[%s1314_s27 + $0x68] sm:$0xff]   ;;  %p1078_p8 = pnand %p1077_p1, %p1279_p13  ;;  %p1084_p2 = scmp.lt.s32.totalorder %s1082_s18, %s1076_s7 }
  0x45   : > { %861 = vmatprep.subr.bf16.mxu0 %v1000_v2  ;;  %907 = vmatprep.subr.bf16.mxu1 %v1000_v2  ;;  %v1018_v20 = vld [vmem:[%s1314_s27 + $0x30] sm:$0xff]   ;;  %v1020_v22 = vld [vmem:[%s1314_s27 + $0x38] sm:$0xff]   ;;  %v1343_v24 = vld [vmem:[%s1469_s2] ss:$0 sm:$0xff] }
  0x46   : > { %v1019_v21 = vld [vmem:[%s1314_s27 + $0x70] sm:$0xff]   ;;  %v1021_v23 = vld [vmem:[%s1314_s27 + $0x78] sm:$0xff]   ;;  %p1079_p12 = pneg %p1078_p8  ;;  %p1085_p3 = por %p1084_p2, %p1083_p0 }
  0x48   : > { %862 = vmatpush3.bf16.msra.mxu0 %v1000_v2  ;;  %915 = vmatpush3.bf16.msra.mxu1 %v1000_v2  ;;  %p1086_p5 = pnand %p1085_p3, %p1079_p12 }
  0x49   : > { %863 = vmatprep.subr.bf16.mxu0 %v1001_v3  ;;  %908 = vmatprep.subr.bf16.mxu1 %v1001_v3 }
  0x4c   : > { %864 = vmatpush3.bf16.msra.mxu0 %v1001_v3  ;;  %916 = vmatpush3.bf16.msra.mxu1 %v1001_v3 }
  0x4d   : > { %865 = vmatprep.subr.bf16.mxu0 %v1002_v6  ;;  %909 = vmatprep.subr.bf16.mxu1 %v1002_v6 }
  0x50   : > { %866 = vmatpush3.bf16.msra.mxu0 %v1002_v6  ;;  %917 = vmatpush3.bf16.msra.mxu1 %v1002_v6 }
  0x51   : > { %867 = vmatprep.subr.bf16.mxu0 %v1003_v7  ;;  %910 = vmatprep.subr.bf16.mxu1 %v1003_v7 }
  0x54   : > { %868 = vmatpush3.bf16.msra.mxu0 %v1003_v7  ;;  %918 = vmatpush3.bf16.msra.mxu1 %v1003_v7 }
  0x55   : > { %869 = vmatprep.subr.bf16.mxu0 %v1004_v8  ;;  %911 = vmatprep.subr.bf16.mxu1 %v1004_v8 }
  0x58   : > { %870 = vmatpush3.bf16.msra.mxu0 %v1004_v8  ;;  %919 = vmatpush3.bf16.msra.mxu1 %v1004_v8 }
  0x59   : > { %871 = vmatprep.subr.bf16.mxu0 %v1005_v9  ;;  %912 = vmatprep.subr.bf16.mxu1 %v1005_v9 }
  0x5c   : > { %872 = vmatpush3.bf16.msra.mxu0 %v1005_v9  ;;  %920 = vmatpush3.bf16.msra.mxu1 %v1005_v9 }
  0x5f   : > { %874 = vmatmul.mubr.bf16.vlgmr.msra.gmra.mxu0 %v1008_v10  ;;  %890 = vmatmul.mubr.bf16.vlgmr.msra.gmra.mxu1 %v1009_v11 }
  0x60   : > { %877 = vmatprep.mubr.bf16.mxu0 %v1010_v12  ;;  %893 = vmatprep.mubr.bf16.mxu1 %v1011_v13 }
  0x67   : > { %878 = vmatmul.mubr.bf16.gmra.mxu0 %v1012_v14  ;;  %894 = vmatmul.mubr.bf16.gmra.mxu1 %v1013_v15 }
  0x68   : > { %881 = vmatprep.mubr.bf16.mxu0 %v1014_v16  ;;  %897 = vmatprep.mubr.bf16.mxu1 %v1015_v17 }
  0x6f   : > { %882 = vmatmul.mubr.bf16.gmra.mxu0 %v1016_v18  ;;  %898 = vmatmul.mubr.bf16.gmra.mxu1 %v1017_v19 }
  0x70   : > { %885 = vmatprep.mubr.bf16.mxu0 %v1018_v20  ;;  %901 = vmatprep.mubr.bf16.mxu1 %v1019_v21 }
  0x77   : > { %886 = vmatmul.mubr.bf16.gmra.mxu0 %v1020_v22  ;;  %902 = vmatmul.mubr.bf16.gmra.mxu1 %v1021_v23 }
 0x11f   : > { %v875_v25 = vpop.f32.mrf.mxu0  ;;  %v891_v26 = vpop.f32.mrf.mxu1 }
 0x120   : > { %v484_v27 = vadd.f32 %v875_v25, %v1343_v24  ;;  %v548_v28 = vadd.f32 %v891_v26, %v1343_v24 }
 0x121   : > { %v475_v29 = vpop.f32.mrf.mxu0  ;;  %v539_v30 = vpop.f32.mrf.mxu1 }
 0x122   : > { %v604_v31 = vmul.f32 0.0028300877, %v484_v27  ;;  %v620_v32 = vmul.f32 0.0028300877, %v548_v28  ;;  %v476_v33 = vadd.f32 %v1343_v24, %v475_v29  ;;  %v540_v34 = vadd.f32 %v1343_v24, %v539_v30 }
 0x123   : > { %v876_v35 = vpop.f32.mrf.mxu0  ;;  %v892_v36 = vpop.f32.mrf.mxu1 }
 0x124   : > { %636 = vst [vmem:[%s1350_s30 + $0x10] sm:$0xff] %v604_v31  ;;  %652 = vst [vmem:[%s1350_s30 + $0x90] sm:$0xff] %v620_v32  ;;  %v602_v37 = vmul.f32 0.0028300877, %v476_v33  ;;  %v618_v38 = vmul.f32 0.0028300877, %v540_v34  ;;  %v487_v39 = vadd.f32 %v876_v35, %v1343_v24  ;;  %v551_v40 = vadd.f32 %v892_v36, %v1343_v24 }
 0x125   : > { %v478_v41 = vpop.f32.mrf.mxu0  ;;  %v542_v42 = vpop.f32.mrf.mxu1 }
 0x126   : > { %634 = vst [vmem:[%s1350_s30] sm:$0xff] %v602_v37  ;;  %650 = vst [vmem:[%s1350_s30 + $0x80] sm:$0xff] %v618_v38  ;;  %v605_v43 = vmul.f32 0.0028300877, %v487_v39  ;;  %v621_v44 = vmul.f32 0.0028300877, %v551_v40  ;;  %v479_v45 = vadd.f32 %v1343_v24, %v478_v41  ;;  %v543_v46 = vadd.f32 %v1343_v24, %v542_v42 }
 0x127   : > { %v879_v47 = vpop.f32.mrf.mxu0  ;;  %v895_v48 = vpop.f32.mrf.mxu1 }
 0x128   : > { %637 = vst [vmem:[%s1350_s30 + $0x18] sm:$0xff] %v605_v43  ;;  %653 = vst [vmem:[%s1350_s30 + $0x98] sm:$0xff] %v621_v44  ;;  %v603_v49 = vmul.f32 0.0028300877, %v479_v45  ;;  %v619_v50 = vmul.f32 0.0028300877, %v543_v46  ;;  %v500_v51 = vadd.f32 %v879_v47, %v1343_v24  ;;  %v564_v52 = vadd.f32 %v895_v48, %v1343_v24 }
 0x129   : > { %v491_v53 = vpop.f32.mrf.mxu0  ;;  %v555_v54 = vpop.f32.mrf.mxu1 }
 0x12a   : > { %635 = vst [vmem:[%s1350_s30 + $0x8] sm:$0xff] %v603_v49  ;;  %651 = vst [vmem:[%s1350_s30 + $0x88] sm:$0xff] %v619_v50  ;;  %v608_v55 = vmul.f32 0.0028300877, %v500_v51  ;;  %v624_v56 = vmul.f32 0.0028300877, %v564_v52  ;;  %v492_v57 = vadd.f32 %v1343_v24, %v491_v53  ;;  %v556_v58 = vadd.f32 %v1343_v24, %v555_v54 }
 0x12b   : > { %v880_v59 = vpop.f32.mrf.mxu0  ;;  %v896_v60 = vpop.f32.mrf.mxu1 }
 0x12c   : > { %640 = vst [vmem:[%s1350_s30 + $0x30] sm:$0xff] %v608_v55  ;;  %656 = vst [vmem:[%s1350_s30 + $0xb0] sm:$0xff] %v624_v56  ;;  %v606_v61 = vmul.f32 0.0028300877, %v492_v57  ;;  %v622_v62 = vmul.f32 0.0028300877, %v556_v58  ;;  %v503_v63 = vadd.f32 %v880_v59, %v1343_v24  ;;  %v567_v0 = vadd.f32 %v896_v60, %v1343_v24 }
 0x12d   : > { %v494_v1 = vpop.f32.mrf.mxu0  ;;  %v558_v2 = vpop.f32.mrf.mxu1 }
 0x12e   : > { %638 = vst [vmem:[%s1350_s30 + $0x20] sm:$0xff] %v606_v61  ;;  %654 = vst [vmem:[%s1350_s30 + $0xa0] sm:$0xff] %v622_v62  ;;  %v609_v3 = vmul.f32 0.0028300877, %v503_v63  ;;  %v625_v4 = vmul.f32 0.0028300877, %v567_v0  ;;  %v495_v5 = vadd.f32 %v1343_v24, %v494_v1  ;;  %v559_v6 = vadd.f32 %v1343_v24, %v558_v2 }
 0x12f   : > { %v883_v7 = vpop.f32.mrf.mxu0  ;;  %v899_v8 = vpop.f32.mrf.mxu1 }
 0x130   : > { %641 = vst [vmem:[%s1350_s30 + $0x38] sm:$0xff] %v609_v3  ;;  %657 = vst [vmem:[%s1350_s30 + $0xb8] sm:$0xff] %v625_v4  ;;  %v607_v9 = vmul.f32 0.0028300877, %v495_v5  ;;  %v623_v10 = vmul.f32 0.0028300877, %v559_v6  ;;  %v516_v11 = vadd.f32 %v883_v7, %v1343_v24  ;;  %v580_v12 = vadd.f32 %v899_v8, %v1343_v24 }
 0x131   : > { %v507_v13 = vpop.f32.mrf.mxu0  ;;  %v571_v14 = vpop.f32.mrf.mxu1 }
 0x132   : > { %639 = vst [vmem:[%s1350_s30 + $0x28] sm:$0xff] %v607_v9  ;;  %655 = vst [vmem:[%s1350_s30 + $0xa8] sm:$0xff] %v623_v10  ;;  %v612_v15 = vmul.f32 0.0028300877, %v516_v11  ;;  %v628_v16 = vmul.f32 0.0028300877, %v580_v12  ;;  %v508_v17 = vadd.f32 %v1343_v24, %v507_v13  ;;  %v572_v18 = vadd.f32 %v1343_v24, %v571_v14 }
 0x133   : > { %v884_v19 = vpop.f32.mrf.mxu0  ;;  %v900_v20 = vpop.f32.mrf.mxu1 }
 0x134   : > { %644 = vst [vmem:[%s1350_s30 + $0x50] sm:$0xff] %v612_v15  ;;  %660 = vst [vmem:[%s1350_s30 + $0xd0] sm:$0xff] %v628_v16  ;;  %v610_v21 = vmul.f32 0.0028300877, %v508_v17  ;;  %v626_v22 = vmul.f32 0.0028300877, %v572_v18  ;;  %v519_v23 = vadd.f32 %v884_v19, %v1343_v24  ;;  %v583_v25 = vadd.f32 %v900_v20, %v1343_v24 }
 0x135   : > { %v510_v26 = vpop.f32.mrf.mxu0  ;;  %v574_v27 = vpop.f32.mrf.mxu1 }
 0x136   : > { %642 = vst [vmem:[%s1350_s30 + $0x40] sm:$0xff] %v610_v21  ;;  %658 = vst [vmem:[%s1350_s30 + $0xc0] sm:$0xff] %v626_v22  ;;  %v613_v28 = vmul.f32 0.0028300877, %v519_v23  ;;  %v629_v29 = vmul.f32 0.0028300877, %v583_v25  ;;  %v511_v30 = vadd.f32 %v1343_v24, %v510_v26  ;;  %v575_v31 = vadd.f32 %v1343_v24, %v574_v27 }
 0x137   : > { %v887_v32 = vpop.f32.mrf.mxu0  ;;  %v903_v33 = vpop.f32.mrf.mxu1 }
 0x138   : > { %645 = vst [vmem:[%s1350_s30 + $0x58] sm:$0xff] %v613_v28  ;;  %661 = vst [vmem:[%s1350_s30 + $0xd8] sm:$0xff] %v629_v29  ;;  %v611_v34 = vmul.f32 0.0028300877, %v511_v30  ;;  %v627_v35 = vmul.f32 0.0028300877, %v575_v31  ;;  %v532_v36 = vadd.f32 %v887_v32, %v1343_v24  ;;  %v596_v37 = vadd.f32 %v903_v33, %v1343_v24 }
 0x139   : > { %v523_v38 = vpop.f32.mrf.mxu0  ;;  %v587_v39 = vpop.f32.mrf.mxu1 }
 0x13a   : > { %643 = vst [vmem:[%s1350_s30 + $0x48] sm:$0xff] %v611_v34  ;;  %659 = vst [vmem:[%s1350_s30 + $0xc8] sm:$0xff] %v627_v35  ;;  %v616_v40 = vmul.f32 0.0028300877, %v532_v36  ;;  %v632_v41 = vmul.f32 0.0028300877, %v596_v37  ;;  %v524_v42 = vadd.f32 %v1343_v24, %v523_v38  ;;  %v588_v43 = vadd.f32 %v1343_v24, %v587_v39 }
 0x13b   : > { %v888_v44 = vpop.f32.mrf.mxu0  ;;  %v904_v45 = vpop.f32.mrf.mxu1 }
 0x13c   : > { %648 = vst [vmem:[%s1350_s30 + $0x70] sm:$0xff] %v616_v40  ;;  %664 = vst [vmem:[%s1350_s30 + $0xf0] sm:$0xff] %v632_v41  ;;  %v614_v46 = vmul.f32 0.0028300877, %v524_v42  ;;  %v630_v47 = vmul.f32 0.0028300877, %v588_v43  ;;  %v535_v48 = vadd.f32 %v888_v44, %v1343_v24  ;;  %v599_v49 = vadd.f32 %v904_v45, %v1343_v24 }
 0x13d   : > { %v526_v50 = vpop.f32.mrf.mxu0  ;;  %v590_v51 = vpop.f32.mrf.mxu1 }
 0x13e   : > { %646 = vst [vmem:[%s1350_s30 + $0x60] sm:$0xff] %v614_v46  ;;  %662 = vst [vmem:[%s1350_s30 + $0xe0] sm:$0xff] %v630_v47  ;;  %v617_v52 = vmul.f32 0.0028300877, %v535_v48  ;;  %v633_v53 = vmul.f32 0.0028300877, %v599_v49  ;;  %v527_v54 = vadd.f32 %v1343_v24, %v526_v50  ;;  %v591_v55 = vadd.f32 %v1343_v24, %v590_v51 }
 0x140   : > { %649 = vst [vmem:[%s1350_s30 + $0x78] sm:$0xff] %v617_v52  ;;  %665 = vst [vmem:[%s1350_s30 + $0xf8] sm:$0xff] %v633_v53  ;;  %v615_v56 = vmul.f32 0.0028300877, %v527_v54  ;;  %v631_v57 = vmul.f32 0.0028300877, %v591_v55 }
 0x142   : > { %647 = vst [vmem:[%s1350_s30 + $0x68] sm:$0xff] %v615_v56  ;;  %663 = vst [vmem:[%s1350_s30 + $0xe8] sm:$0xff] %v631_v57 }
 0x143   : > { %1089 = shalt.err (!%p1086_p5)
}
 0x144   : > { %s1090_s4 = scalar_lea.hbm %s1413_s10, 4096  ;;  %s1094_s20 = scalar_lea.hbm %s1470_s3, 8192 }
 0x145   : > { %p1091_p7 = scmp.ne.s32.totalorder %s1413_s10, %s1090_s4  ;;  %p1095_p9 = scmp.lt.s32.totalorder %s1413_s10, %s1470_s3 }
 0x146   : > { %p1096_p11 = scmp.lt.s32.totalorder %s1094_s20, %s1090_s4 }
 0x147   : > { %p1092_p4 = pnand %p1091_p7, %p1279_p13 }
 0x148   : > { %p1097_p10 = por %p1096_p11, %p1095_p9 }
 0x149   : > { %p1093_p6 = pneg %p1092_p4 }
 0x14b   : > { %p1098_p1 = pnand %p1097_p10, %p1093_p6 }
 0x14d   : > { %1101 = shalt.err (!%p1098_p1)
}
 0x14e   : > { %s1167_s30 = smov 128   ;;  %s1168_s29 = smov 8  }
 0x14f   : > { %927 = dma.vmem_to_hbm [thread:$0]  (%p1279_p13), %s1415_s5, 4096, %s1413_s10, %s667_s15, %s1167_s30, %s1167_s30, %s1168_s29  }
 0x150 PF: > { %s696_s6 = sand.u32 1, %s1140_s12   ;;  %p1486_p8 = scmp.ne.s32.totalorder %s1477_s23, 0 }
 0x151   : > { %p1487_p12 = scmp.ge.s32.totalorder %s1160_s17, 2  ;;  %s697_s21 = scalar_lea.sflag [#allocation4], %s696_s6 }
 0x153   : > { %p938_p0 = pnand %p1487_p12, %p1486_p8 }
 0x155   : > { %p939_p2 = pneg %p938_p0 }
 0x157   : > { %1135 = dma.done.wait (%p939_p2), %s697_s21, 4096  }
 0x158   : > { %1137 = vsyncadd (%p939_p2), %s697_s21, 4294963200  ;;  %s20_s17 = sadd.s32 1, %s1160_s17   ;;  %s1488_s12 = smov %s1144_s13 }
 0x159   : > { %p17_p3 = scmp.ge.s32.totalorder %s20_s17, 4   ;;  %s1489_s13 = smov %s1148_s14 }
 0x15a   : > { %s1490_s14 = smov %s1288_s19  ;;  %s1491_s15 = smov %s1156_s16 }
 0x15b   : > { %s1492_s16 = smov %s1494_s28  ;;  %19 = sbr.rel (!%p17_p3) target bundleno = 7 (0x7), region = 85 }
 0x160   :  { %702 = vsyncpa [#allocation3], 1 }
 0x161   :  { %704 = vsyncpa [#allocation3 + $0x1], 1 }
 0x162   :  { %705 = vsyncpa [#allocation6], 1 }
 0x163   :  { %706 = vsyncpa [#allocation4], 1 }
 0x164   :  { %708 = vsyncpa [#allocation4 + $0x1], 1 }

</bundles_post_ra>
